<compile_context>
chip_gen: v5e
topology: v5e:2x2
jax: 0.10.0
libtpu: 0.0.40
codegen_flags: <defaults>
</compile_context>

<pallas_src>
import functools

import jax
import jax.numpy as jnp
from jax import lax
from jax.experimental import pallas as pl
from jax.experimental.pallas import tpu as pltpu


# Explicit scoped-VMEM budget: above the v5e/v6e defaults, below v7x's 64 MiB
# physical per TensorCore (leaves headroom for compiler-internal scratch).
_VMEM_LIMIT_BYTES = 48 * 1024 * 1024


# ---------------------------------------------------------------------------
# Kernel 1: conv-as-matmul (bf16 inputs, f32 accumulate) producing a lane-dense
#           (Cout, TM) tile, plus per-grid-step per-channel partial sum / sum-sq
#           (reduced in the wrapper -> grid axis stays "parallel").
# ---------------------------------------------------------------------------
def conv_stats_kernel(a_ref, w_ref, y_ref, psum_ref, pssq_ref):
    y = jnp.dot(w_ref[...], a_ref[...], preferred_element_type=jnp.float32)  # (Cout, TM) f32
    y_ref[...] = y
    # Per-channel partial stats for this grid step (XLU reduce; filler under MXU).
    psum_ref[...] = jnp.sum(y, axis=1, keepdims=True)[None]        # (1, Cout, 1)
    pssq_ref[...] = jnp.sum(y * y, axis=1, keepdims=True)[None]    # (1, Cout, 1)


# ---------------------------------------------------------------------------
# Kernel 2: fused BatchNorm affine (pre-folded scale/shift) + LeakyReLU(0.01),
#           lane-dense (Cout, TM) tiles.
# ---------------------------------------------------------------------------
def bn_lrelu_kernel(y_ref, scale_ref, shift_ref, o_ref):
    y = y_ref[...] * scale_ref[...] + shift_ref[...]
    o_ref[...] = jnp.where(y >= 0, y, jnp.float32(0.01) * y)


# TODO(synk): build the ks*ks patches in-kernel from an NHWC x tile (strided
# pl.ds taps / manual DMA) to avoid materializing the expanded im2col slab in HBM.
def _im2col_t(x, ks, stride, pad):
    """x: (N, Cin, H, W) -> A_T: (Cin*ks*ks, N*OH*OW), plus (OH, OW)."""
    N, C, H, W = x.shape
    OH = (H + 2 * pad - ks) // stride + 1
    OW = (W + 2 * pad - ks) // stride + 1
    xp = jnp.pad(x, ((0, 0), (0, 0), (pad, pad), (pad, pad)))
    cols = []
    for ki in range(ks):
        for kj in range(ks):
            cols.append(xp[:, :, ki:ki + stride * OH:stride, kj:kj + stride * OW:stride])
    patches = jnp.stack(cols, axis=2)                    # (N, C, ks*ks, OH, OW)
    # K index = ci*ks*ks + ki*ks + kj  (matches conv_w.reshape(Cout, Cin*ks*ks))
    a_t = jnp.transpose(patches, (1, 2, 0, 3, 4)).reshape(C * ks * ks, N * OH * OW)
    return a_t, OH, OW


def _choose_tm(m):
    """Largest lane tile in {512, 256, 128} that still gives >=2 grid steps when possible."""
    for tm in (512, 256, 128):
        if m >= 2 * tm:
            return tm
    return 128


@functools.partial(jax.jit, static_argnames=("stride", "ks"))
def conv_bn_relu(x, conv_w, conv_b, bn_gamma, bn_beta, *, stride, ks):
    """Forward of ConvBNReLU. x: (N, Cin, H, W) f32. Returns (N, Cout, OH, OW) f32."""
    # conv_b is intentionally unused: train-mode BN subtracts the batch mean, so a
    # per-channel bias cancels exactly in the forward output.
    del conv_b
    N, Cin, H, W = x.shape
    Cout = conv_w.shape[0]
    pad = (ks - 1) // 2
    eps = 1e-5

    # ---- glue: transposed im2col (layout plumbing only) ----
    a_t, OH, OW = _im2col_t(x, ks, stride, pad)            # (K, M) f32
    K, M = a_t.shape

    TM = _choose_tm(M)
    M_pad = ((M + TM - 1) // TM) * TM
    if M_pad != M:
        a_t = jnp.pad(a_t, ((0, 0), (0, M_pad - M)))       # zero cols -> zero conv output
    G = M_pad // TM

    # bf16 matmul inputs (f32 accumulation on the MXU); halves HBM read traffic on A_T.
    a_bf = a_t.astype(jnp.bfloat16)
    w_bf = conv_w.reshape(Cout, Cin * ks * ks).astype(jnp.bfloat16)

    cparams = pltpu.CompilerParams(
        dimension_semantics=("parallel",),
        vmem_limit_bytes=_VMEM_LIMIT_BYTES,
    )

    # ---- Pallas call 1: conv matmul + per-channel partial stats ----
    y_t, psum, pssq = pl.pallas_call(
        conv_stats_kernel,
        out_shape=(
            jax.ShapeDtypeStruct((Cout, M_pad), jnp.float32),
            jax.ShapeDtypeStruct((G, Cout, 1), jnp.float32),
            jax.ShapeDtypeStruct((G, Cout, 1), jnp.float32),
        ),
        grid_spec=pltpu.PrefetchScalarGridSpec(
            num_scalar_prefetch=0,
            grid=(G,),
            in_specs=[
                pl.BlockSpec((K, TM), lambda i: (0, i)),       # A_T tile (lane-dense)
                pl.BlockSpec((Cout, K), lambda i: (0, 0)),     # W resident
            ],
            out_specs=[
                pl.BlockSpec((Cout, TM), lambda i: (0, i)),    # lane-dense stores
                pl.BlockSpec((1, Cout, 1), lambda i: (i, 0, 0)),
                pl.BlockSpec((1, Cout, 1), lambda i: (i, 0, 0)),
            ],
        ),
        compiler_params=cparams,
    )(a_bf, w_bf)

    # ---- glue: fold train-mode BatchNorm (biased variance) into scale/shift ----
    csum = jnp.sum(psum, axis=0)                            # (Cout, 1)
    cssq = jnp.sum(pssq, axis=0)                            # (Cout, 1)
    mean = csum / jnp.float32(M)                            # divide by the *real* M
    var = cssq / jnp.float32(M) - mean * mean               # biased, as in PyTorch training
    scale = bn_gamma.reshape(Cout, 1) * lax.rsqrt(var + eps)
    shift = bn_beta.reshape(Cout, 1) - mean * scale

    # ---- Pallas call 2: fused BN affine + LeakyReLU ----
    out_t = pl.pallas_call(
        bn_lrelu_kernel,
        out_shape=jax.ShapeDtypeStruct((Cout, M_pad), jnp.float32),
        grid_spec=pltpu.PrefetchScalarGridSpec(
            num_scalar_prefetch=0,
            grid=(G,),
            in_specs=[
                pl.BlockSpec((Cout, TM), lambda i: (0, i)),
                pl.BlockSpec((Cout, 1), lambda i: (0, 0)),
                pl.BlockSpec((Cout, 1), lambda i: (0, 0)),
            ],
            out_specs=pl.BlockSpec((Cout, TM), lambda i: (0, i)),
        ),
        compiler_params=cparams,
    )(y_t, scale, shift)

    # ---- glue: drop M padding, back to NCHW (single axis swap) ----
    out = out_t[:, :M].reshape(Cout, N, OH, OW).transpose(1, 0, 2, 3)
    return out


def _reference(x, conv_w, conv_b, bn_gamma, bn_beta, *, stride, ks):
    """Pure-JAX reference (XLA conv + train-mode BN + LeakyReLU)."""
    pad = (ks - 1) // 2
    y = lax.conv_general_dilated(
        x, conv_w, window_strides=(stride, stride),
        padding=[(pad, pad), (pad, pad)],
        dimension_numbers=("NCHW", "OIHW", "NCHW"),
        precision=lax.Precision.HIGHEST,
        preferred_element_type=jnp.float32,
    ) + conv_b.reshape(1, -1, 1, 1)
    mean = jnp.mean(y, axis=(0, 2, 3), keepdims=True)
    var = jnp.mean((y - mean) ** 2, axis=(0, 2, 3), keepdims=True)
    yhat = (y - mean) * lax.rsqrt(var + 1e-5)
    yhat = yhat * bn_gamma.reshape(1, -1, 1, 1) + bn_beta.reshape(1, -1, 1, 1)
    return jnp.where(yhat >= 0, yhat, 0.01 * yhat)


if __name__ == "__main__":
    # Small shapes consistent with the module: nin=4, nout=8, ks=3, stride=2.
    N, Cin, H, W = 2, 4, 32, 32
    Cout, ks, stride = 8, 3, 2

    key = jax.random.PRNGKey(0)
    kx, kw, kb = jax.random.split(key, 3)
    x = jax.random.normal(kx, (N, Cin, H, W), dtype=jnp.float32)
    conv_w = jax.random.normal(kw, (Cout, Cin, ks, ks), dtype=jnp.float32) * 0.1
    conv_b = jax.random.normal(kb, (Cout,), dtype=jnp.float32) * 0.1
    bn_gamma = jnp.ones((Cout,), dtype=jnp.float32)   # PyTorch BatchNorm2d default init
    bn_beta = jnp.zeros((Cout,), dtype=jnp.float32)

    out = conv_bn_relu(x, conv_w, conv_b, bn_gamma, bn_beta, stride=stride, ks=ks)
    out = jax.block_until_ready(out)

    pad = (ks - 1) // 2
    OH = (H + 2 * pad - ks) // stride + 1
    OW = (W + 2 * pad - ks) // stride + 1
    assert out.shape == (N, Cout, OH, OW)

    # Tight check: reference on the same bf16-rounded conv inputs (isolates the
    # intentional bf16-matmul-input quantization from kernel correctness).
    x_q = x.astype(jnp.bfloat16).astype(jnp.float32)
    w_q = conv_w.astype(jnp.bfloat16).astype(jnp.float32)
    ref_q = _reference(x_q, w_q, conv_b, bn_gamma, bn_beta, stride=stride, ks=ks)
    assert jnp.allclose(out, ref_q, atol=1e-3, rtol=1e-3), "mismatch vs bf16-rounded reference"

    # Loose check: full-f32 module semantics (bf16 input rounding only perturbs
    # the normalized output by O(1e-3)).
    ref = _reference(x, conv_w, conv_b, bn_gamma, bn_beta, stride=stride, ks=ks)
    assert jnp.allclose(out, ref, atol=5e-2, rtol=5e-2), "mismatch vs f32 reference"

    print("KERNEL_OK")
</pallas_src>

<mosaic_0001>
module attributes {stable_mosaic.version = 11 : i64} {
  func.func @conv_stats_kernel(%arg0: i32, %arg1: memref<36x256xbf16, #tpu.memory_space<vmem>>, %arg2: memref<8x36xbf16, #tpu.memory_space<vmem>>, %arg3: memref<8x256xf32, #tpu.memory_space<vmem>>, %arg4: memref<1x8x1xf32, #tpu.memory_space<vmem>>, %arg5: memref<1x8x1xf32, #tpu.memory_space<vmem>>) attributes {dimension_semantics = [#tpu.dimension_semantics<parallel>], iteration_bounds = array<i64: 2>, scalar_prefetch = 0 : i64, scratch_operands = 0 : i64, tpu.core_type = #tpu.core_type<tc>, window_params = [{transform_indices = @transform_0, window_bounds = array<i64: 36, 256>}, {pipeline_mode = #tpu.pipeline_mode<synchronous>, transform_indices = @transform_1, window_bounds = array<i64: 8, 36>}, {transform_indices = @transform_2, window_bounds = array<i64: 8, 256>}, {transform_indices = @transform_3, window_bounds = array<i64: 1, 8, 1>}, {transform_indices = @transform_4, window_bounds = array<i64: 1, 8, 1>}]} {
    %c0 = arith.constant 0 : index
    %c0_0 = arith.constant 0 : index
    %0 = vector.load %arg2[%c0, %c0_0] : memref<8x36xbf16, #tpu.memory_space<vmem>>, vector<8x36xbf16>
    %c0_1 = arith.constant 0 : index
    %c0_2 = arith.constant 0 : index
    %1 = vector.load %arg1[%c0_1, %c0_2] : memref<36x256xbf16, #tpu.memory_space<vmem>>, vector<36x256xbf16>
    %cst = arith.constant dense<0.000000e+00> : vector<8x256xf32>
    %2 = tpu.matmul %0, %1, %cst {dimension_numbers = #tpu.dot_dimension_numbers<[1], [0], [0], [1], [0, 0, 1, 1], [], []>} : vector<8x36xbf16>, vector<36x256xbf16>, vector<8x256xf32> -> vector<8x256xf32>
    %c0_3 = arith.constant 0 : index
    %c0_4 = arith.constant 0 : index
    %3 = vector.load %arg3[%c0_3, %c0_4] : memref<8x256xf32, #tpu.memory_space<vmem>>, vector<8x256xf32>
    tpu.vector_store %arg3[%c0_3, %c0_4], %2 {strides = array<i32>} : memref<8x256xf32, #tpu.memory_space<vmem>>, vector<8x256xf32>,
    %cst_5 = arith.constant dense<0.000000e+00> : vector<8xf32>
    %4 = vector.multi_reduction <add>, %2, %cst_5 [1] : vector<8x256xf32> to vector<8xf32>
    %5 = vector.shape_cast %4 : vector<8xf32> to vector<8x1xf32>
    %6 = vector.shape_cast %5 : vector<8x1xf32> to vector<1x8x1xf32>
    %c0_6 = arith.constant 0 : index
    %c0_7 = arith.constant 0 : index
    %c0_8 = arith.constant 0 : index
    %7 = vector.load %arg4[%c0_6, %c0_7, %c0_8] : memref<1x8x1xf32, #tpu.memory_space<vmem>>, vector<1x8x1xf32>
    tpu.vector_store %arg4[%c0_6, %c0_7, %c0_8], %6 {strides = array<i32>} : memref<1x8x1xf32, #tpu.memory_space<vmem>>, vector<1x8x1xf32>,
    %8 = arith.mulf %2, %2 : vector<8x256xf32>
    %cst_9 = arith.constant dense<0.000000e+00> : vector<8xf32>
    %9 = vector.multi_reduction <add>, %8, %cst_9 [1] : vector<8x256xf32> to vector<8xf32>
    %10 = vector.shape_cast %9 : vector<8xf32> to vector<8x1xf32>
    %11 = vector.shape_cast %10 : vector<8x1xf32> to vector<1x8x1xf32>
    %c0_10 = arith.constant 0 : index
    %c0_11 = arith.constant 0 : index
    %c0_12 = arith.constant 0 : index
    %12 = vector.load %arg5[%c0_10, %c0_11, %c0_12] : memref<1x8x1xf32, #tpu.memory_space<vmem>>, vector<1x8x1xf32>
    tpu.vector_store %arg5[%c0_10, %c0_11, %c0_12], %11 {strides = array<i32>} : memref<1x8x1xf32, #tpu.memory_space<vmem>>, vector<1x8x1xf32>,
    return
  }
  func.func @transform_0(%arg0: i32) -> (i32, i32) {
    %c0_i32 = arith.constant 0 : i32
    %c0_i32_0 = arith.constant 0 : i32
    return %c0_i32, %arg0 : i32, i32
  }
  func.func @transform_1(%arg0: i32) -> (i32, i32) {
    %c0_i32 = arith.constant 0 : i32
    %c0_i32_0 = arith.constant 0 : i32
    %c0_i32_1 = arith.constant 0 : i32
    return %c0_i32, %c0_i32_0 : i32, i32
  }
  func.func @transform_2(%arg0: i32) -> (i32, i32) {
    %c0_i32 = arith.constant 0 : i32
    %c0_i32_0 = arith.constant 0 : i32
    return %c0_i32, %arg0 : i32, i32
  }
  func.func @transform_3(%arg0: i32) -> (i32, i32, i32) {
    %c0_i32 = arith.constant 0 : i32
    %c0_i32_0 = arith.constant 0 : i32
    %c0_i32_1 = arith.constant 0 : i32
    return %arg0, %c0_i32, %c0_i32_0 : i32, i32, i32
  }
  func.func @transform_4(%arg0: i32) -> (i32, i32, i32) {
    %c0_i32 = arith.constant 0 : i32
    %c0_i32_0 = arith.constant 0 : i32
    %c0_i32_1 = arith.constant 0 : i32
    return %arg0, %c0_i32, %c0_i32_0 : i32, i32, i32
  }
}

module attributes {stable_mosaic.version = 11 : i64} {
  func.func @bn_lrelu_kernel(%arg0: i32, %arg1: memref<8x256xf32, #tpu.memory_space<vmem>>, %arg2: memref<8x1xf32, #tpu.memory_space<vmem>>, %arg3: memref<8x1xf32, #tpu.memory_space<vmem>>, %arg4: memref<8x256xf32, #tpu.memory_space<vmem>>) attributes {dimension_semantics = [#tpu.dimension_semantics<parallel>], iteration_bounds = array<i64: 2>, scalar_prefetch = 0 : i64, scratch_operands = 0 : i64, tpu.core_type = #tpu.core_type<tc>, window_params = [{transform_indices = @transform_0, window_bounds = array<i64: 8, 256>}, {pipeline_mode = #tpu.pipeline_mode<synchronous>, transform_indices = @transform_1, window_bounds = array<i64: 8, 1>}, {pipeline_mode = #tpu.pipeline_mode<synchronous>, transform_indices = @transform_2, window_bounds = array<i64: 8, 1>}, {transform_indices = @transform_3, window_bounds = array<i64: 8, 256>}]} {
    %c0 = arith.constant 0 : index
    %c0_0 = arith.constant 0 : index
    %0 = vector.load %arg1[%c0, %c0_0] : memref<8x256xf32, #tpu.memory_space<vmem>>, vector<8x256xf32>
    %c0_1 = arith.constant 0 : index
    %c0_2 = arith.constant 0 : index
    %1 = vector.load %arg2[%c0_1, %c0_2] : memref<8x1xf32, #tpu.memory_space<vmem>>, vector<8x1xf32>
    %2 = vector.broadcast %1 : vector<8x1xf32> to vector<8x256xf32>
    %3 = arith.mulf %0, %2 : vector<8x256xf32>
    %c0_3 = arith.constant 0 : index
    %c0_4 = arith.constant 0 : index
    %4 = vector.load %arg3[%c0_3, %c0_4] : memref<8x1xf32, #tpu.memory_space<vmem>>, vector<8x1xf32>
    %5 = vector.broadcast %4 : vector<8x1xf32> to vector<8x256xf32>
    %6 = arith.addf %3, %5 : vector<8x256xf32>
    %cst = arith.constant 0.000000e+00 : f32
    %7 = vector.broadcast %cst : f32 to vector<8x256xf32>
    %8 = arith.cmpf oge, %6, %7 : vector<8x256xf32>
    %cst_5 = arith.constant 0.00999999977 : f32
    %9 = vector.broadcast %cst_5 : f32 to vector<8x256xf32>
    %10 = arith.mulf %9, %6 : vector<8x256xf32>
    %11 = arith.select %8, %6, %10 : vector<8x256xi1>, vector<8x256xf32>
    %c0_6 = arith.constant 0 : index
    %c0_7 = arith.constant 0 : index
    %12 = vector.load %arg4[%c0_6, %c0_7] : memref<8x256xf32, #tpu.memory_space<vmem>>, vector<8x256xf32>
    tpu.vector_store %arg4[%c0_6, %c0_7], %11 {strides = array<i32>} : memref<8x256xf32, #tpu.memory_space<vmem>>, vector<8x256xf32>,
    return
  }
  func.func @transform_0(%arg0: i32) -> (i32, i32) {
    %c0_i32 = arith.constant 0 : i32
    %c0_i32_0 = arith.constant 0 : i32
    return %c0_i32, %arg0 : i32, i32
  }
  func.func @transform_1(%arg0: i32) -> (i32, i32) {
    %c0_i32 = arith.constant 0 : i32
    %c0_i32_0 = arith.constant 0 : i32
    %c0_i32_1 = arith.constant 0 : i32
    return %c0_i32, %c0_i32_0 : i32, i32
  }
  func.func @transform_2(%arg0: i32) -> (i32, i32) {
    %c0_i32 = arith.constant 0 : i32
    %c0_i32_0 = arith.constant 0 : i32
    %c0_i32_1 = arith.constant 0 : i32
    return %c0_i32, %c0_i32_0 : i32, i32
  }
  func.func @transform_3(%arg0: i32) -> (i32, i32) {
    %c0_i32 = arith.constant 0 : i32
    %c0_i32_0 = arith.constant 0 : i32
    return %c0_i32, %arg0 : i32, i32
  }
}

</mosaic_0001>

<bundles_post_ra>
// kernel: conv_bn_relu.3
= control target key start
LH: loop header
LB: loop body
LE: loop exit
PB: predicated region body
PF: predicated region fallthrough
CT: control target
= control target key end

     0   :  { %s306_s12 = smov 0   ;;  %s329_s0 = inlined_call_operand.vmem [shape: f32[8,512], index: 0, kind: input, shape index: {}]   ;;  %s330_s1 = inlined_call_operand.vmem [shape: f32[8,1], index: 1, kind: input, shape index: {}]   ;;  %s331_s2 = inlined_call_operand.vmem [shape: f32[8,1], index: 2, kind: input, shape index: {}]   ;;  %s332_s3 = inlined_call_operand.vmem [shape: f32[8,512], index: 3, kind: output, shape index: {}]  }
   0x1 LB: > { %s256_s13 = sadd.s32 4294967295, %s283_s12   ;;  %p260_p0 = scmp.ge.s32.totalorder %s283_s12, 1  ;;  %s283_s12 = sphi %s306_s12, %s13_s12  }
   0x2   : > { %p138_p1 = scmp.lt.s32.totalorder %s283_s12, 3 }
   0x4   : > { %p139_p2 = pnand %p260_p0, %p138_p1 }
   0x5   : > { %s261_s18 = sshll.u32 (!%p139_p2), %s256_s13, 1 }
   0x6   : > { %142 = sbr.rel (%p139_p2) target bundleno = 143 (0x8f), region = 32  ;;  %p163_p3 = scmp.lt.s32.totalorder (!%p139_p2), %s261_s18, 3 }
   0xb   : > { %v176_v0 = vld [vmem:[%s330_s1] sm:$0xff]  ;;  %v285_v1 = vmov 0   ;;  %s334_s18 = smov (!%p163_p3, %s261_s18), 3 }
   0xc   : > { %276 = vset.pattern.permute.xlu0 %v285_v1  ;;  %v184_v2 = vld [vmem:[%s331_s2] sm:$0xff]  ;;  %s262_s19 = sshll.u32 %s334_s18, 3 }
   0xd   : > { %179 = vperm.xlu0 %276, %v176_v0   ;;  %s166_s22 = scalar_lea.vmem %s329_s0, %s262_s19  ;;  %s172_s25 = scalar_lea.vmem %s332_s3, %s262_s19 }
   0xe   : > { %v174_v4 = vld [vmem:[%s166_s22] sm:$0xff]  ;;  %v175_v5 = vld [vmem:[%s166_s22 + $0x8] sm:$0xff] }
  0x15   : > { %187 = vperm.xlu0 %276, %v184_v2  }
  0x7f   : > { %v180_v3 = vpop.permute.xlu0 %179 }
  0x80   : > { %v182_v6 = vmul.f32 %v180_v3, %v174_v4  ;;  %v183_v7 = vmul.f32 %v180_v3, %v175_v5 }
  0x87   : > { %v188_v8 = vpop.permute.xlu0 %187 }
  0x88   : > { %v190_v9 = vadd.f32 %v188_v8, %v182_v6  ;;  %v191_v10 = vadd.f32 %v188_v8, %v183_v7 }
  0x8a   : > { %vm192_vm0 = vcmp.ge.f32.partialorder %v190_v9, 0.0  ;;  %vm193_vm1 = vcmp.ge.f32.partialorder %v191_v10, 0.0  ;;  %v194_v11 = vmul.f32 0.01, %v190_v9  ;;  %v195_v12 = vmul.f32 0.01, %v191_v10 }
  0x8c   : > { %v196_v13 = vsel %vm192_vm0, %v190_v9, %v194_v11  ;;  %v197_v14 = vsel %vm193_vm1, %v191_v10, %v195_v12 }
  0x8d   : > { %198 = vst [vmem:[%s172_s25] sm:$0xff] %v196_v13 }
  0x8e   : > { %199 = vst [vmem:[%s172_s25 + $0x8] sm:$0xff] %v197_v14 }
  0x8f PF: > { %s13_s12 = sadd.s32 1, %s283_s12  }
  0x90   : > { %p10_p4 = scmp.ge.s32.totalorder %s13_s12, 4  }
  0x92   :  { %12 = sbr.rel (!%p10_p4) target bundleno = 1 (0x1), region = 62 }

// kernel: conv_bn_relu.2
= control target key start
LH: loop header
LB: loop body
LE: loop exit
PB: predicated region body
PF: predicated region fallthrough
CT: control target
= control target key end

     0   :  { %s590_s15 = smov 0   ;;  %s592_s16 = smov 0   ;;  %s654_s0 = inlined_call_operand.vmem [shape: bf16[36,512], index: 0, kind: input, shape index: {}]   ;;  %s655_s1 = inlined_call_operand.vmem [shape: bf16[8,36], index: 1, kind: input, shape index: {}]   ;;  %s656_s2 = inlined_call_operand.vmem [shape: f32[8,512], index: 2, kind: output, shape index: {0}]   ;;  %s657_s3 = inlined_call_operand.vmem [shape: f32[2,8,1], index: 3, kind: output, shape index: {1}]   ;;  %s658_s4 = inlined_call_operand.vmem [shape: f32[2,8,1], index: 4, kind: output, shape index: {2}]  }
   0x1   :  { %s594_s17 = smov 0  }
   0x2 LB: > { %s606_s18 = sadd.s32 4294967295, %s563_s17   ;;  %s609_s19 = sadd.s32 1, %s563_s17   ;;  %s563_s17 = sphi %s594_s17, %s661_s17   ;;  %s559_s16 = sphi %s592_s16, %s660_s16   ;;  %s555_s15 = sphi %s590_s15, %s659_s15  }
   0x3   : > { %s19_s20 = ssub.s32 %s563_s17, %s609_s19  ;;  %s22_s21 = sadd.s32 1, %s559_s16 }
   0x4   : > { %p20_p0 = scmp.eq.s32.totalorder %s19_s20, 0  ;;  %p29_p1 = scmp.ne.s32.totalorder %s559_s16, %s555_s15 }
   0x5   : > { %p30_p2 = scmp.eq.s32.totalorder %s563_s17, 0  ;;  %p482_p4 = scmp.ge.s32.totalorder %s563_s17, 2 }
   0x6   : > { %s618_s22 = scalar_select %p20_p0, %s559_s16, %s22_s21  }
   0x7   : > { %p31_p3 = por %p30_p2, %p29_p1  ;;  %157 = sbr.rel (%p482_p4) target bundleno = 21 (0x15), region = 20 }
   0xc   : > { %160 = sbr.rel (!%p31_p3) target bundleno = 21 (0x15), region = 24  ;;  %s162_s23 = sand.u32 (%p31_p3), 1, %s559_s16  }
   0xd   : > { %s510_s24 = sshll.u32 (%p31_p3), %s563_s17, 3  ;;  %s515_s25 = smul.u32 (%p31_p3), 40, %s162_s23 }
   0xe   : > { %s167_s28 = scalar_lea.vmem (%p31_p3), %s654_s0, %s510_s24 }
   0xf   : > { %v204_v0 = vld [vmem:[%s167_s28] sm:$0xff] (%p31_p3)  ;;  %v206_v1 = vld [vmem:[%s167_s28 + $0x10] sm:$0xff] (%p31_p3)  ;;  %s164_s29 = scalar_lea.vmem (%p31_p3), [#allocation2], %s515_s25 }
  0x10   : > { %v208_v2 = vld [vmem:[%s167_s28 + $0x20] sm:$0xff] (%p31_p3)  ;;  %205 = vst [vmem:[%s164_s29] sm:$0xff] (%p31_p3), %v204_v0  ;;  %v210_v3 = vld [vmem:[%s167_s28 + $0x30] sm:$0xff] (%p31_p3) }
  0x11   : > { %207 = vst [vmem:[%s164_s29 + $0x8] sm:$0xff] %v206_v1  ;;  %v212_v4 = vld [vmem:[%s167_s28 + $0x40] sm:$0xff] }
  0x12   : > { %209 = vst [vmem:[%s164_s29 + $0x10] sm:$0xff] %v208_v2 }
  0x13   : > { %211 = vst [vmem:[%s164_s29 + $0x18] sm:$0xff] %v210_v3 }
  0x14   : > { %213 = vst [vmem:[%s164_s29 + $0x20] sm:$0xff] %v212_v4 }
  0x15 PF: > { %p485_p5 = scmp.ge.s32.totalorder %s563_s17, 1  ;;  %p218_p6 = scmp.lt.s32.totalorder %s563_s17, 3 }
  0x17   : > { %p219_p7 = pnand %p485_p5, %p218_p6 }
  0x18   : > { %s225_s30 = sand.u32 (!%p219_p7), 1, %s555_s15   ;;  %s486_s9 = sshll.u32 (!%p219_p7), %s606_s18, 1 }
  0x19   : > { %222 = sbr.rel (%p219_p7) target bundleno = 300 (0x12c), region = 62  ;;  %p260_p8 = scmp.lt.s32.totalorder (!%p219_p7), %s486_s9, 3 }
  0x1a   : > { %s516_s5 = smul.u32 (!%p219_p7), 40, %s225_s30  ;;  %p265_p9 = scmp.lt.s32.totalorder (!%p219_p7), %s606_s18, 1 }
  0x1c   : > { %s227_s6 = scalar_lea.vmem (!%p219_p7), [#allocation2], %s516_s5 }
  0x1e   : > { %v279_v5 = vld [vmem:[%s227_s6 + $0x20] sm:$0x33]  ;;  %vm309_vm0 = vcmask 1041408   ;;  %v500_v8 = vld [vmem:[%s227_s6 + $0x10] sm:$0xf]  ;;  %vm305_vm1 = vcmask 293888  }
  0x1f   : > { %v293_v6 = vunpack.c.l.b16 %v279_v5  ;;  %v294_v7 = vunpack.c.h.b16 %v279_v5  ;;  %v514_v11 = vld [vmem:[%s227_s6 + $0x14] sm:$0xf0]  ;;  %v513_v12 = vld [vmem:[%s227_s6 + $0x14] sm:$0xf]  ;;  %v502_v13 = vld [vmem:[%s227_s6 + $0x18] sm:$0xf0] }
  0x20   : > { %v501_v16 = vor.u32 %v514_v11, %v500_v8  ;;  %v505_v17 = vor.u32 %v513_v12, %v502_v13  ;;  %v492_v18 = vld [vmem:[%s227_s6] sm:$0xf]  ;;  %v512_v19 = vld [vmem:[%s227_s6 + $0x4] sm:$0xf0]  ;;  %v511_v20 = vld [vmem:[%s227_s6 + $0x4] sm:$0xf] }
  0x21   : > { %v299_v9 = vpack.c.b16 %v293_v6, %v293_v6  ;;  %v300_v10 = vpack.c.b16 %v294_v7, %v294_v7  ;;  %v494_v21 = vld [vmem:[%s227_s6 + $0x8] sm:$0xf0]  ;;  %v493_v22 = vor.u32 %v512_v19, %v492_v18  ;;  %v274_v24 = vld [vmem:[%s655_s1] sm:$0xf]  ;;  %s663_s9 = smov (!%p260_p8, %s486_s9), 3  ;;  %s665_s18 = smov (!%p265_p9, %s606_s18), 1 }
  0x22   : > { %v497_v23 = vor.u32 %v511_v20, %v494_v21  ;;  %s487_s10 = sshll.u32 %s663_s9, 3  ;;  %s488_s14 = sshll.u32 %s665_s18, 3  ;;  %vm347_vm2 = vcmask 7168  }
  0x23   : > { %v311_v14 = vsel %vm309_vm0, %v299_v9, 0  ;;  %v314_v15 = vsel %vm309_vm0, %v300_v10, 0  ;;  %s263_s13 = scalar_lea.vmem %s656_s2, %s487_s10  ;;  %s268_s20 = scalar_lea.vmem %s657_s3, %s488_s14 }
  0x24   : > { %321 = vmatpush.bf16.msra.mxu0 %v311_v14  ;;  %334 = vmatpush.bf16.msra.mxu1 %v314_v15  ;;  %s272_s24 = scalar_lea.vmem %s658_s4, %s488_s14 }
  0x28   : > { %322 = vmatpush.bf16.msra.mxu0 %v501_v16  ;;  %335 = vmatpush.bf16.msra.mxu1 %v505_v17 }
  0x2c   : > { %323 = vmatpush.bf16.msra.mxu0 %v493_v22  ;;  %336 = vmatpush.bf16.msra.mxu1 %v497_v23 }
  0x2f   : > { %506 = vmatmul.msk.bf16.vlgmr.msra.gmra.mxu0 %vm305_vm1, %v274_v24  ;;  %507 = vmatmul.msk.bf16.vlgmr.msra.gmra.mxu1 %vm305_vm1, %v274_v24 }
  0xac   : > { %v325_v25 = vpop.f32.mrf.mxu0  ;;  %v338_v26 = vpop.f32.mrf.mxu1 }
  0xad   : > { %342 = vst [vmem:[%s263_s13] sm:$0xff] %v325_v25  ;;  %v344_v27 = vadd.f32 %v338_v26, %v325_v25  ;;  %v349_v28 = vmul.f32 %v325_v25, %v325_v25  ;;  %v350_v29 = vmul.f32 %v338_v26, %v338_v26 }
  0xae   : > { %343 = vst [vmem:[%s263_s13 + $0x8] sm:$0xff] %v338_v26 }
  0xaf   : > { %345 = vadd.xlane.f32.xlu0 %v344_v27  ;;  %v351_v32 = vadd.f32 %v350_v29, %v349_v28 }
  0xb4   : > { %v327_v30 = vpop.f32.mrf.mxu0  ;;  %v340_v31 = vpop.f32.mrf.mxu1 }
  0xb7   : > { %352 = vadd.xlane.f32.xlu0 %v351_v32 }
 0x122   : > { %v346_v33 = vpop.xlane.xlu0 %345 }
 0x123   : > { %348 = vst.msk [vmem:[%s268_s20] sm:$0xff] %vm347_vm2, %v346_v33 }
 0x12a   : > { %v353_v34 = vpop.xlane.xlu0 %352 }
 0x12b   : > { %354 = vst.msk [vmem:[%s272_s24] sm:$0xff] %vm347_vm2, %v353_v34 }
 0x12c PF: > { %p12_p10 = scmp.ge.s32.totalorder %s609_s19, 4   ;;  %s659_s15 = smov %s559_s16 }
 0x12d   : > { %s660_s16 = smov %s618_s22  ;;  %s661_s17 = smov %s609_s19 }
 0x12e   :  { %14 = sbr.rel (!%p12_p10) target bundleno = 2 (0x2), region = 125 }

</bundles_post_ra>
